<compile_context>
chip_gen: v5e
topology: v5e:2x2
jax: 0.10.0
libtpu: 0.0.40
codegen_flags: <defaults>
</compile_context>

<pallas_src>
import math

import jax
import jax.numpy as jnp
import numpy as np
from jax.experimental import pallas as pl
from jax.experimental.pallas import tpu as pltpu


def _cdiv(a: int, b: int) -> int:
    return -(-a // b)


# ----------------------------- Pallas kernel --------------------------------
def _make_kernel(valid: int, tile: int):
    """Kernel closure over static sizes (valid token count, token tile size)."""

    def kernel(x_ref, t_ref, o_ref):
        # x_ref/o_ref: (bt, tile, D); t_ref: (tile, D) lane-dense blocks.
        start = pl.program_id(0) * tile  # first token index of this tile

        @pl.when(start + tile <= valid)           # tile fully inside valid region
        def _():
            o_ref[...] = x_ref[...] + t_ref[...]

        @pl.when(start >= valid)                  # tile fully in the pad region
        def _():
            o_ref[...] = jnp.zeros_like(o_ref)

        if valid % tile != 0:                     # a straddling tile exists
            @pl.when(jnp.logical_and(start < valid, start + tile > valid))
            def _():
                tok = jax.lax.broadcasted_iota(jnp.int32, o_ref.shape, 1)
                vals = x_ref[...] + t_ref[...]
                o_ref[...] = jnp.where(start + tok < valid, vals,
                                       jnp.zeros_like(vals))

    return kernel


# ----------------------------- block planning -------------------------------
def _plan_blocks(batch: int, s_out: int, d: int, itemsize: int,
                 budget_bytes: int):
    """Pick (batch_block, token_tile): ~budget_bytes per x buffer, dtype-aware."""
    granule = max(8, 32 // itemsize)       # sublane packing: f32->8, bf16->16, i8->32
    row = d * itemsize                     # bytes per token row per batch element

    # Prefer folding the full batch into the block so fully-padded token tiles
    # reuse the previous step's DMA (clamped index => skipped copy).
    bt = batch
    if bt * row * granule > budget_bytes:
        bt = max(1, budget_bytes // (row * granule))

    tile = max(granule, (budget_bytes // (bt * row)) // granule * granule)
    if tile >= s_out:
        if s_out >= 2 * granule:
            # keep at least 2 token tiles so v7x's two TensorCores both engage
            tile = _cdiv(_cdiv(s_out, 2), granule) * granule
        else:
            tile = s_out                   # full extent (always layout-legal)
    return bt, tile


# ------------------------------- wrapper -------------------------------------
def precompute_encoding_table(pe, te, n_thoughts_taken: int, max_thoughts: int,
                              dtype=jnp.float32):
    """Combined pe+te table, [s_out, D], zero beyond the valid token range.

    Depends only on (pe, te, n_thoughts_taken, max_thoughts) -> build once and
    reuse across forward calls instead of rebuilding every step.
    """
    max_len, d = pe.shape
    thoughts = n_thoughts_taken + 1
    valid = max_len * thoughts
    s_out = max_len * max_thoughts
    table = (pe[:, None, :] + te[None, :thoughts, :]).reshape(valid, d)
    # TODO(synk): for bf16/fp16 x, PyTorch promotes x+pe+te to f32; here the
    # table is cast to x.dtype (one extra rounding) to keep the kernel one add.
    return jnp.pad(table, ((0, s_out - valid), (0, 0))).astype(dtype)


def dual_positional_encoding(x, pe, te, n_thoughts_taken, *, table=None,
                             buffer_budget_bytes: int = 2 << 20):
    """x: [B, S, D]; pe: [max_len, D]; te: [max_thought_len+1, D]."""
    assert isinstance(n_thoughts_taken, int), \
        "n_thoughts_taken must be a static Python int (it shapes the output)"
    B, S, D = x.shape
    max_len = pe.shape[0]
    max_thoughts = S // max_len
    thoughts = n_thoughts_taken + 1
    assert thoughts <= max_thoughts, "n_thoughts_taken+1 exceeds max thought slots"
    valid = max_len * thoughts
    s_out = max_len * max_thoughts             # PyTorch output sequence length

    if table is None:
        table = precompute_encoding_table(pe, te, n_thoughts_taken,
                                          max_thoughts, x.dtype)
    assert table.shape == (s_out, D)

    bt, tile = _plan_blocks(B, s_out, D, x.dtype.itemsize, buffer_budget_bytes)
    n_tok = _cdiv(s_out, tile)
    n_b = _cdiv(B, bt)
    j_last = (valid - 1) // tile   # last token-block index holding valid tokens

    # Clamp the input block index for fully-padded token tiles: the block index
    # then repeats between consecutive steps and Mosaic skips the input DMA.
    # Correctness is unaffected because those tiles write pure zeros.
    def x_map(j, b):
        return (b, jnp.minimum(j, j_last), 0)

    def t_map(j, b):
        return (jnp.minimum(j, j_last), 0)

    out = pl.pallas_call(
        _make_kernel(valid, tile),
        out_shape=jax.ShapeDtypeStruct((B, s_out, D), x.dtype),
        # Token tiles on the OUTER axis, batch chunks inner: the table block
        # index only depends on the outer axis, so its VMEM tile stays resident
        # across the (usually trivial) inner batch loop.
        grid=(n_tok, n_b),
        in_specs=[
            pl.BlockSpec((bt, tile, D), x_map),    # x (full x passed, no slice)
            pl.BlockSpec((tile, D), t_map),        # combined pe+te table
        ],
        out_specs=pl.BlockSpec((bt, tile, D), lambda j, b: (b, j, 0)),
        compiler_params=pltpu.CompilerParams(
            dimension_semantics=("parallel", "parallel")),
    )(x, table)
    return out


# --------------------------- parameter construction -------------------------
def make_params(d_model, context_len, max_thought_len, key):
    max_len = context_len // (max_thought_len + 1)
    position = jnp.arange(max_len, dtype=jnp.float32)[:, None]
    div_term = jnp.exp(
        jnp.arange(0, d_model, 2, dtype=jnp.float32) * (-math.log(10000.0) / d_model)
    )
    pe = jnp.zeros((max_len, d_model), dtype=jnp.float32)
    pe = pe.at[:, 0::2].set(jnp.sin(position * div_term))
    pe = pe.at[:, 1::2].set(jnp.cos(position * div_term))

    # position_in_thought_encoding ~ Normal(0, 0.01), deterministic seed.
    te = 0.01 * jax.random.normal(key, (max_thought_len + 1, d_model),
                                  dtype=jnp.float32)
    return pe, te


# ------------------------------- reference ----------------------------------
def reference(x, pe, te, n_thoughts_taken):
    B, S, D = x.shape
    max_len = pe.shape[0]
    max_thoughts = S // max_len
    thoughts = n_thoughts_taken + 1
    valid = max_len * thoughts
    s_out = max_len * max_thoughts
    xv = x[:, :valid, :].reshape(B, max_len, thoughts, D)
    xv = xv + pe[None, :, None, :] + te[None, None, :thoughts, :]
    out = xv.reshape(B, valid, D)
    return jnp.pad(out, ((0, 0), (0, s_out - valid), (0, 0)))


if __name__ == "__main__":
    d_model = 128
    max_thought_len = 4
    context_len = 40                       # max_len = 40 // 5 = 8, max_thoughts = 5
    batch = 2
    n_thoughts_taken = 2                   # -> thoughts = 3, valid = 24 tokens

    key = jax.random.PRNGKey(0)
    kx, kte = jax.random.split(key)
    x = jax.random.normal(kx, (batch, context_len, d_model), dtype=jnp.float32)
    pe, te = make_params(d_model, context_len, max_thought_len, kte)

    # Hoisted once outside the forward call (depends only on pe/te/thoughts).
    max_len = context_len // (max_thought_len + 1)
    max_thoughts = context_len // max_len
    table = precompute_encoding_table(pe, te, n_thoughts_taken, max_thoughts,
                                      x.dtype)

    out = dual_positional_encoding(x, pe, te, n_thoughts_taken, table=table)
    out = jax.block_until_ready(out)

    ref = jax.block_until_ready(reference(x, pe, te, n_thoughts_taken))
    np.testing.assert_allclose(np.asarray(out), np.asarray(ref),
                               rtol=1e-6, atol=1e-6)

    print("KERNEL_OK")
</pallas_src>

<mosaic_0001>
module attributes {stable_mosaic.version = 11 : i64} {
  func.func @kernel(%arg0: i32, %arg1: i32, %arg2: memref<2x24x128xf32, #tpu.memory_space<vmem>>, %arg3: memref<24x128xf32, #tpu.memory_space<vmem>>, %arg4: memref<2x24x128xf32, #tpu.memory_space<vmem>>) attributes {dimension_semantics = [#tpu.dimension_semantics<parallel>, #tpu.dimension_semantics<parallel>], iteration_bounds = array<i64: 2, 1>, scalar_prefetch = 0 : i64, scratch_operands = 0 : i64, tpu.core_type = #tpu.core_type<tc>, window_params = [{transform_indices = @transform_0, window_bounds = array<i64: 2, 24, 128>}, {transform_indices = @transform_1, window_bounds = array<i64: 24, 128>}, {transform_indices = @transform_2, window_bounds = array<i64: 2, 24, 128>}]} {
    %c24_i32 = arith.constant 24 : i32
    %0 = arith.muli %arg0, %c24_i32 : i32
    %c24_i32_0 = arith.constant 24 : i32
    %1 = arith.addi %0, %c24_i32_0 : i32
    %c24_i32_1 = arith.constant 24 : i32
    %2 = arith.cmpi sle, %1, %c24_i32_1 : i32
    %3 = arith.extui %2 : i1 to i32
    %c0_i32 = arith.constant 0 : i32
    %4 = arith.cmpi ne, %3, %c0_i32 : i32
    scf.if %4 {
      %c0 = arith.constant 0 : index
      %c0_4 = arith.constant 0 : index
      %c0_5 = arith.constant 0 : index
      %8 = vector.load %arg2[%c0, %c0_4, %c0_5] : memref<2x24x128xf32, #tpu.memory_space<vmem>>, vector<2x24x128xf32>
      %c0_6 = arith.constant 0 : index
      %c0_7 = arith.constant 0 : index
      %9 = vector.load %arg3[%c0_6, %c0_7] : memref<24x128xf32, #tpu.memory_space<vmem>>, vector<24x128xf32>
      %10 = vector.shape_cast %9 : vector<24x128xf32> to vector<1x24x128xf32>
      %11 = vector.broadcast %10 : vector<1x24x128xf32> to vector<2x24x128xf32>
      %12 = arith.addf %8, %11 : vector<2x24x128xf32>
      %c0_8 = arith.constant 0 : index
      %c0_9 = arith.constant 0 : index
      %c0_10 = arith.constant 0 : index
      %13 = vector.load %arg4[%c0_8, %c0_9, %c0_10] : memref<2x24x128xf32, #tpu.memory_space<vmem>>, vector<2x24x128xf32>
      tpu.vector_store %arg4[%c0_8, %c0_9, %c0_10], %12 {strides = array<i32>} : memref<2x24x128xf32, #tpu.memory_space<vmem>>, vector<2x24x128xf32>,
    } else {
    }
    %c24_i32_2 = arith.constant 24 : i32
    %5 = arith.cmpi sge, %0, %c24_i32_2 : i32
    %6 = arith.extui %5 : i1 to i32
    %c0_i32_3 = arith.constant 0 : i32
    %7 = arith.cmpi ne, %6, %c0_i32_3 : i32
    scf.if %7 {
      %cst = arith.constant 0.000000e+00 : f32
      %8 = vector.broadcast %cst : f32 to vector<2x24x128xf32>
      %c0 = arith.constant 0 : index
      %c0_4 = arith.constant 0 : index
      %c0_5 = arith.constant 0 : index
      %9 = vector.load %arg4[%c0, %c0_4, %c0_5] : memref<2x24x128xf32, #tpu.memory_space<vmem>>, vector<2x24x128xf32>
      tpu.vector_store %arg4[%c0, %c0_4, %c0_5], %8 {strides = array<i32>} : memref<2x24x128xf32, #tpu.memory_space<vmem>>, vector<2x24x128xf32>,
    } else {
    }
    return
  }
  func.func @transform_0(%arg0: i32, %arg1: i32) -> (i32, i32, i32) {
    %c0_i32 = arith.constant 0 : i32
    %0 = arith.minsi %arg0, %c0_i32 : i32
    %c0_i32_0 = arith.constant 0 : i32
    %c0_i32_1 = arith.constant 0 : i32
    return %arg1, %0, %c0_i32_0 : i32, i32, i32
  }
  func.func @transform_1(%arg0: i32, %arg1: i32) -> (i32, i32) {
    %c0_i32 = arith.constant 0 : i32
    %0 = arith.minsi %arg0, %c0_i32 : i32
    %c0_i32_0 = arith.constant 0 : i32
    %c0_i32_1 = arith.constant 0 : i32
    return %0, %c0_i32_0 : i32, i32
  }
  func.func @transform_2(%arg0: i32, %arg1: i32) -> (i32, i32, i32) {
    %c0_i32 = arith.constant 0 : i32
    %c0_i32_0 = arith.constant 0 : i32
    return %arg1, %arg0, %c0_i32 : i32, i32, i32
  }
}

</mosaic_0001>

<bundles_post_ra>
// kernel: tpu_custom_call.1
= control target key start
LH: loop header
LB: loop body
LE: loop exit
PB: predicated region body
PF: predicated region fallthrough
CT: control target
= control target key end

     0   :  { %7 = vsyncpa [#allocation3], 0  ;;  %s958_s0 = inlined_call_operand.hbm [shape: f32[2,40,128], index: 0, kind: input, shape index: {}]   ;;  %s959_s1 = inlined_call_operand.hbm [shape: f32[40,128], index: 1, kind: input, shape index: {}]   ;;  %s960_s2 = inlined_call_operand.hbm [shape: f32[2,40,128], index: 2, kind: output, shape index: {}]  }
   0x1   :  { %9 = vsyncpa [#allocation3 + $0x1], 0 }
   0x2   :  { %10 = vsyncpa [#allocation6], 0 }
   0x3   :  { %12 = vsyncpa [#allocation6 + $0x1], 0 }
   0x4   :  { %13 = vsyncpa [#allocation4], 0 }
   0x5   :  { %15 = vsyncpa [#allocation4 + $0x1], 0  ;;  %s784_s9 = smov 0   ;;  %s786_s10 = smov 0  }
   0x6   :  { %s788_s11 = smov 0   ;;  %s790_s12 = smov 0  }
   0x7   :  { %s792_s13 = smov 0   ;;  %s794_s14 = smov 0  }
   0x8   :  { %s796_s15 = smov 0   ;;  %s798_s16 = smov 0  }
   0x9 LB: > { %s495_s17 = sadd.s32 4294967295, %s749_s16   ;;  %s496_s18 = sadd.s32 4294967294, %s749_s16   ;;  %s749_s16 = sphi %s798_s16, %s21_s16   ;;  %s745_s15 = sphi %s796_s15, %s971_s15   ;;  %s741_s14 = sphi %s794_s14, %s970_s14   ;;  %s737_s13 = sphi %s792_s13, %s948_s13   ;;  %s733_s12 = sphi %s790_s12, %s969_s12   ;;  %s729_s11 = sphi %s788_s11, %s968_s11   ;;  %s725_s10 = sphi %s786_s10, %s967_s10   ;;  %s721_s9 = sphi %s784_s9, %s966_s9  }
   0xa   : > { %s33_s19 = sadd.s32 1, %s745_s15  ;;  %p718_p1 = scmp.ne.s32.totalorder %s737_s13, 0 }
   0xb   : > { %p35_p0 = scmp.ge.s32.totalorder %s33_s19, 2  ;;  %p54_p2 = scmp.eq.s32.totalorder %s749_s16, 0 }
   0xc   : > { %p59_p3 = scmp.ne.s32.totalorder %s737_s13, %s733_s12  ;;  %p60_p5 = scmp.eq.s32.totalorder %s495_s17, 0 }
   0xd   : > { %s973_s19 = smov (%p35_p0, %s33_s19), 0  ;;  %p830_p4 = por %p718_p1, %p54_p2 }
   0xe   : > { %p834_p6 = por %p60_p5, %p59_p3  ;;  %s100_s22 = ssub.s32 %s745_s15, %s973_s19 }
   0xf   : > { %p102_p7 = scmp.eq.s32.totalorder %s100_s22, 0  ;;  %s104_s23 = sadd.s32 1, %s729_s11 }
  0x10   : > { %p114_p8 = scmp.ne.s32.totalorder %s729_s11, %s725_s10  ;;  %p115_p9 = scmp.eq.s32.totalorder %s495_s17, 1 }
  0x11   : > { %s842_s24 = scalar_select %p102_p7, %s729_s11, %s104_s23  }
  0x12   : > { %p120_p10 = scmp.ne.s32.totalorder %s725_s10, %s721_s9  ;;  %p121_p11 = scmp.eq.s32.totalorder %s496_s18, 1 }
  0x13   : > { %p848_p12 = por %p115_p9, %p114_p8  ;;  %p498_p0 = scmp.ge.s32.totalorder %s749_s16, 2 }
  0x14   : > { %p852_p13 = por %p121_p11, %p120_p10 }
  0x15   : > { %137 = sbr.rel (%p498_p0) target bundleno = 60 (0x3c), region = 16 }
  0x1a   : > { %140 = sbr.rel (!%p830_p4) target bundleno = 42 (0x2a), region = 20 }
  0x1f   : > { %s168_s27 = sld [smem:[#allocation0]]   ;;  %s751_s28 = smov [#allocation2]  }
  0x20   : > { %s178_s29 = sshll.u32 %s751_s28, 4  ;;  %s176_s4 = sshll.u32 %s958_s0, 4  ;;  %s179_s29 = int_to_ptr.vmem [resolvable:$true] %s178_s29  ;;  %s177_s4 = int_to_ptr.hbm [resolvable:$true] %s176_s4 }
  0x21   : > { %s752_s5 = smov 640   ;;  %s753_s6 = smov 384  }
  0x22   : > { %185 = sst [smem:[#allocation9]] %s752_s5  ;;  %s754_s8 = smov 3  }
  0x23   : > { %187 = sst [smem:[#allocation9 + $0x1]] %s753_s6  ;;  %s755_s17 = smov 128  }
  0x24   : > { %189 = sst [smem:[#allocation9 + $0x2]] %s754_s8  ;;  %s756_s18 = smov 8  }
  0x25   : > { %s504_s7 = sshll.u32 %s168_s27, 26  ;;  %191 = sst [smem:[#allocation9 + $0x3]] %s755_s17 }
  0x26   : > { %s505_s12 = sadd.s32 134217728, %s504_s7  ;;  %193 = sst [smem:[#allocation9 + $0x4]] %s755_s17 }
  0x27   : > { %195 = sst [smem:[#allocation9 + $0x5]] %s756_s18  ;;  %s757_s22 = smov [#allocation3]  }
  0x28   : > { %s758_s23 = smov [#allocation8]  }
  0x29   : > { %197 = dma.general %s177_s4, 768, %s179_s29, %s757_s22, %s758_s23, [#allocation9], %s505_s12, 0  }
  0x2a PF: > { %200 = sbr.rel (!%p830_p4) target bundleno = 60 (0x3c), region = 24  ;;  %s759_s28 = smov (%p830_p4), [#allocation5]  }
  0x2b   : > { %s222_s30 = sshll.u32 (%p830_p4), %s759_s28, 4  ;;  %s220_s5 = sshll.u32 (%p830_p4), %s959_s1, 4  ;;  %s223_s30 = int_to_ptr.vmem [resolvable:$true] %s222_s30  ;;  %s221_s5 = int_to_ptr.hbm [resolvable:$true] %s220_s5 }
  0x2c   : > { %s629_s6 = sshra.s32 (%p830_p4), %s221_s5, 4  ;;  %s640_s29 = scalar_lea.hbm (%p830_p4), %s959_s1, 40  ;;  %s630_s6 = int_to_ptr.hbm [resolvable:$true] %s629_s6 }
  0x2d   : > { %s636_s7 = scalar_lea.hbm (%p830_p4), %s630_s6, 24 }
  0x2e   : > { %p637_p1 = scmp.ne.s32.totalorder (%p830_p4), %s630_s6, %s636_s7  ;;  %p642_p2 = scmp.lt.s32.totalorder (%p830_p4), %s640_s29, %s636_s7 }
  0x30   : > { %p644_p3 = pnand %p642_p2, %p637_p1 }
  0x32   : > { %647 = shalt.err (!%p644_p3)
}
  0x33   : > { %s648_s20 = sshra.s32 %s223_s30, 4  ;;  %s659_s12 = scalar_lea.vmem %s759_s28, 48  ;;  %s649_s20 = int_to_ptr.vmem [resolvable:$true] %s648_s20 }
  0x34   : > { %s655_s4 = scalar_lea.vmem %s649_s20, 24 }
  0x35   : > { %p656_p4 = scmp.ne.s32.totalorder %s649_s20, %s655_s4  ;;  %p661_p5 = scmp.lt.s32.totalorder %s659_s12, %s655_s4 }
  0x37   : > { %p663_p7 = pnand %p661_p5, %p656_p4 }
  0x39   : > { %666 = shalt.err (!%p663_p7)
}
  0x3a   : > { %s760_s18 = smov 128   ;;  %s761_s22 = smov 8  }
  0x3b   : > { %228 = dma.hbm_to_vmem [thread:$0]  %s221_s5, 384, %s223_s30, [#allocation6], %s760_s18, %s760_s18, %s761_s22  }
  0x3c PF: > { %p512_p8 = scmp.ge.s32.totalorder %s749_s16, 1  ;;  %p230_p9 = scmp.lt.s32.totalorder %s749_s16, 3 }
  0x3e   : > { %p231_p10 = pnand %p512_p8, %p230_p9 }
  0x3f   : > { %s236_s23 = sand.u32 (!%p231_p10), 1, %s737_s13  }
  0x40   : > { %234 = sbr.rel (%p231_p10) target bundleno = 132 (0x84), region = 28  ;;  %s237_s27 = scalar_lea.sflag (!%p231_p10), [#allocation3], %s236_s23 }
  0x41   : > { %s532_s3 = smul.u32 (!%p231_p10), 48, %s236_s23 }
  0x43   : > { %s240_s28 = scalar_lea.vmem (!%p231_p10), [#allocation2], %s532_s3 }
  0x45   : > { %705 = dma.done.wait (%p834_p6), %s237_s27, 768  }
  0x46   : > { %707 = vsyncadd (%p834_p6), %s237_s27, 4294966528  ;;  %s533_s30 = smul.u32 24, %s236_s23  ;;  %s247_s5 = scalar_lea.sflag [#allocation6], %s236_s23 }
  0x48   : > { %s250_s6 = scalar_lea.vmem [#allocation5], %s533_s30 }
  0x49   : > { %709 = dma.done.wait (%p834_p6), %s247_s5, 384  }
  0x4a   : > { %711 = vsyncadd (%p834_p6), %s247_s5, 4294966912  ;;  %s274_s7 = sand.u32 1, %s725_s10   ;;  %s885_s8 = smul.u32 24, %s741_s14 }
  0x4b   : > { %s534_s17 = smul.u32 48, %s274_s7 }
  0x4c   : > { %s299_s29 = sadd.s32 24, %s885_s8 }
  0x4d   : > { %s890_s20 = scalar_lea.vmem [#allocation7], %s534_s17  ;;  %p513_p11 = scmp.gt.s32.totalorder %s299_s29, 24 }
  0x4f   : > { %303 = sbr.rel (%p513_p11) target bundleno = 94 (0x5e), region = 40 }
  0x54   : > { %v304_v0 = vld [vmem:[%s240_s28] sm:$0xff]  ;;  %v305_v2 = vld [vmem:[%s240_s28 + $0x8] sm:$0xff]  ;;  %v306_v5 = vld [vmem:[%s240_s28 + $0x10] sm:$0xff] }
  0x55   : > { %v310_v1 = vld [vmem:[%s250_s6] sm:$0xff]  ;;  %v311_v4 = vld [vmem:[%s250_s6 + $0x8] sm:$0xff]  ;;  %v312_v6 = vld [vmem:[%s250_s6 + $0x10] sm:$0xff] }
  0x56   : > { %v313_v3 = vadd.f32 %v310_v1, %v304_v0  ;;  %v314_v7 = vadd.f32 %v311_v4, %v305_v2  ;;  %v315_v8 = vadd.f32 %v312_v6, %v306_v5  ;;  %v307_v9 = vld [vmem:[%s240_s28 + $0x18] sm:$0xff]  ;;  %v308_v10 = vld [vmem:[%s240_s28 + $0x20] sm:$0xff]  ;;  %v309_v11 = vld [vmem:[%s240_s28 + $0x28] sm:$0xff] }
  0x57   : > { %v316_v12 = vadd.f32 %v310_v1, %v307_v9  ;;  %v317_v13 = vadd.f32 %v311_v4, %v308_v10  ;;  %v318_v14 = vadd.f32 %v312_v6, %v309_v11 }
  0x58   : > { %319 = vst [vmem:[%s890_s20] sm:$0xff] %v313_v3 }
  0x59   : > { %320 = vst [vmem:[%s890_s20 + $0x8] sm:$0xff] %v314_v7 }
  0x5a   : > { %321 = vst [vmem:[%s890_s20 + $0x10] sm:$0xff] %v315_v8 }
  0x5b   : > { %322 = vst [vmem:[%s890_s20 + $0x18] sm:$0xff] %v316_v12 }
  0x5c   : > { %323 = vst [vmem:[%s890_s20 + $0x20] sm:$0xff] %v317_v13 }
  0x5d   : > { %324 = vst [vmem:[%s890_s20 + $0x28] sm:$0xff] %v318_v14 }
  0x5e PF: > { %p514_p6 = scmp.lt.s32.totalorder %s885_s8, 24 }
  0x60   : > { %328 = sbr.rel (%p514_p6) target bundleno = 108 (0x6c), region = 44 }
  0x65   : > { %v762_v15 = vmov 0.0  }
  0x66   : > { %329 = vst [vmem:[%s890_s20] sm:$0xff] %v762_v15 }
  0x67   : > { %330 = vst [vmem:[%s890_s20 + $0x8] sm:$0xff] %v762_v15 }
  0x68   : > { %331 = vst [vmem:[%s890_s20 + $0x10] sm:$0xff] %v762_v15 }
  0x69   : > { %332 = vst [vmem:[%s890_s20 + $0x18] sm:$0xff] %v762_v15 }
  0x6a   : > { %333 = vst [vmem:[%s890_s20 + $0x20] sm:$0xff] %v762_v15 }
  0x6b   : > { %334 = vst [vmem:[%s890_s20 + $0x28] sm:$0xff] %v762_v15 }
  0x6c PF: > { %s907_s21 = scalar_lea.sflag [#allocation4], %s274_s7  ;;  %342 = sbr.rel (!%p848_p12) target bundleno = 132 (0x84), region = 48 }
  0x71   : > { %s344_s4 = smul.u32 3, %s741_s14 }
  0x73   : > { %s345_s12 = ssub.s32 5, %s344_s4 }
  0x74   : > { %p346_p1 = scmp.lt.s32.totalorder %s345_s12, 3 }
  0x76   : > { %s975_s12 = smov (!%p346_p1, %s345_s12), 3 }
  0x77   : > { %s515_s18 = sshll.u32 %s975_s12, 4 }
  0x78   : > { %s349_s22 = ssub.s32 48, %s515_s18 }
  0x79   : > { %s350_s23 = sshll.u32 %s349_s22, 4 }
  0x7a   : > { %351 = vsyncadd %s907_s21, %s350_s23  ;;  %p916_p2 = scmp.ne.s32.totalorder %s515_s18, 0  ;;  %s356_s14 = scalar_lea.hbm %s960_s2, %s885_s8 }
  0x7b   : > { %s369_s28 = sshll.u32 %s890_s20, 4  ;;  %s371_s30 = sshll.u32 %s356_s14, 4  ;;  %s370_s28 = int_to_ptr.vmem [resolvable:$true] %s369_s28  ;;  %s372_s30 = int_to_ptr.hbm [resolvable:$true] %s371_s30 }
  0x7c   : > { %s529_s5 = sshll.u32 %s975_s12, 8  ;;  %s763_s6 = smov 384  }
  0x7d   : > { %378 = sst [smem:[#allocation11]] %s763_s6  ;;  %s764_s7 = smov 640  }
  0x7e   : > { %380 = sst [smem:[#allocation11 + $0x1]] %s764_s7  ;;  %s765_s17 = smov 128  }
  0x7f   : > { %382 = sst [smem:[#allocation11 + $0x2]] %s975_s12  ;;  %s766_s29 = smov 8  }
  0x80   : > { %384 = sst [smem:[#allocation11 + $0x3]] %s765_s17  ;;  %s767_s4 = smov [#allocation10]  }
  0x81   : > { %386 = sst [smem:[#allocation11 + $0x4]] %s765_s17  ;;  %s768_s18 = smov 0  }
  0x82   : > { %388 = sst [smem:[#allocation11 + $0x5]] %s766_s29 }
  0x83   : > { %390 = dma.general (%p916_p2), %s370_s28, %s529_s5, %s372_s30, %s907_s21, %s767_s4, [#allocation11], %s768_s18, 0  }
  0x84 PF: > { %s399_s8 = sand.u32 1, %s721_s9   ;;  %p539_p12 = pnand %p498_p0, %p852_p13 }
  0x85   : > { %s400_s20 = scalar_lea.sflag [#allocation4], %s399_s8 }
  0x86   : > { %p540_p3 = pneg %p539_p12 }
  0x88   : > { %713 = dma.done.wait (%p540_p3), %s400_s20, 768  }
  0x89   : > { %715 = vsyncadd (%p540_p3), %s400_s20, 4294966528  ;;  %s21_s16 = sadd.s32 1, %s749_s16   ;;  %s966_s9 = smov %s725_s10 }
  0x8a   : > { %p18_p4 = scmp.ge.s32.totalorder %s21_s16, 4   ;;  %s967_s10 = smov %s729_s11 }
  0x8b   : > { %s968_s11 = smov %s842_s24  ;;  %s969_s12 = smov %s737_s13 }
  0x8c   : > { %s948_s13 = smov 0   ;;  %s970_s14 = smov %s745_s15 }
  0x8d   : > { %s971_s15 = smov %s973_s19  ;;  %20 = sbr.rel (!%p18_p4) target bundleno = 9 (0x9), region = 104 }
  0x92   :  { %406 = vsyncpa [#allocation3], 1 }
  0x93   :  { %408 = vsyncpa [#allocation3 + $0x1], 1 }
  0x94   :  { %409 = vsyncpa [#allocation6], 1 }
  0x95   :  { %411 = vsyncpa [#allocation6 + $0x1], 1 }
  0x96   :  { %412 = vsyncpa [#allocation4], 1 }
  0x97   :  { %414 = vsyncpa [#allocation4 + $0x1], 1 }

</bundles_post_ra>
